<compile_context>
chip_gen: v6e
topology: v6e:2x2x1
jax: 0.10.0
libtpu: 0.0.40
codegen_flags: <defaults>
</compile_context>

<pallas_src>
import functools
import math

import jax
import jax.numpy as jnp
from jax import lax
from jax.experimental import pallas as pl
from jax.experimental.pallas import tpu as pltpu


def _round_up(n: int, m: int) -> int:
    return ((n + m - 1) // m) * m


def _pad_cols_kernel(x_ref, o_ref, *, w_in: int, tc: int):
    """One (TB, TC) lane-dense tile of the flattened (B, L_out*D) output.

    Valid data occupies the first `w_in` flattened columns of every batch row;
    everything at column >= w_in is zero padding.
    """
    j = pl.program_id(1)
    col0 = j * tc

    # Tile entirely inside the valid data: straight copy (hot path).
    @pl.when(col0 + tc <= w_in)
    def _copy():
        o_ref[...] = x_ref[...]

    # Tile entirely inside the zero padding: memset only.
    @pl.when(col0 >= w_in)
    def _zero():
        o_ref[...] = jnp.zeros_like(o_ref)

    # Single boundary tile: masked select (input tail past w_in is undefined).
    @pl.when(jnp.logical_and(col0 < w_in, col0 + tc > w_in))
    def _boundary():
        cols = col0 + lax.broadcasted_iota(jnp.int32, o_ref.shape, dimension=1)
        o_ref[...] = jnp.where(cols < w_in, x_ref[...], jnp.zeros_like(o_ref))


def prep_for_pyramid(x: jax.Array, pyramid_size: int, layer_reduction: int = 2) -> jax.Array:
    """JAX/Pallas equivalent of PrepForPyramid.forward."""
    factor = layer_reduction ** pyramid_size
    B, L, *rest = x.shape
    frames_to_add = factor - (L % factor)   # full extra `factor` rows when L % factor == 0
    L_out = L + frames_to_add

    D = int(math.prod(rest)) if rest else 1
    w_in = L * D
    w_out = L_out * D

    if B == 0 or w_in == 0:
        # Degenerate shapes: nothing to copy; plain concat is exact and cheap.
        pad = jnp.zeros((B, frames_to_add, *rest), dtype=x.dtype)
        return jnp.concatenate([x, pad], axis=1)

    # Lane-dense 2-D view: (B, L*D) -> (B, L_out*D).
    x2 = x.reshape(B, w_in)

    itemsize = jnp.dtype(x.dtype).itemsize
    # Batch tile: whole batch when small (block dim == array dim is always legal),
    # otherwise a sublane-aligned chunk.
    tb = B if B <= 128 else 128
    # Column tile: multiple of 128 (lane-dense), capped to ~2 MiB per buffer so
    # double-buffered in+out stays ~8 MiB on every TPU generation.
    target_bytes = 2 * 1024 * 1024
    max_tc = max(128, ((target_bytes // max(1, tb * itemsize)) // 128) * 128)
    tc = min(max_tc, _round_up(w_out, 128))

    n_b = pl.cdiv(B, tb)
    n_c = pl.cdiv(w_out, tc)
    n_c_in = pl.cdiv(w_in, tc)

    kernel = functools.partial(_pad_cols_kernel, w_in=w_in, tc=tc)

    out2 = pl.pallas_call(
        kernel,
        out_shape=jax.ShapeDtypeStruct((B, w_out), x.dtype),
        grid_spec=pltpu.PrefetchScalarGridSpec(
            num_scalar_prefetch=0,
            grid=(n_b, n_c),
            in_specs=[pl.BlockSpec(
                (tb, tc),
                # Clamp to the last valid input column-block; fully-padded
                # tiles never read their (clamped) input.
                lambda i, j: (i, jnp.minimum(j, n_c_in - 1)),
            )],
            out_specs=pl.BlockSpec((tb, tc), lambda i, j: (i, j)),
        ),
        compiler_params=pltpu.CompilerParams(
            dimension_semantics=("parallel", "parallel"),
            vmem_limit_bytes=32 * 1024 * 1024,
        ),
    )(x2)

    return out2.reshape(B, L_out, *rest)


if __name__ == "__main__":
    key = jax.random.PRNGKey(0)

    # Small shapes consistent with the module: (B, L, hidden)
    B, L, D = 2, 8, 32
    pyramid_size, layer_reduction = 2, 2        # factor = 4 -> frames_to_add = 4 -> L_out = 12
    x = jax.random.normal(key, (B, L, D), dtype=jnp.float32)

    out = jax.block_until_ready(prep_for_pyramid(x, pyramid_size, layer_reduction))

    factor = layer_reduction ** pyramid_size
    frames_to_add = factor - (L % factor)
    ref = jnp.concatenate([x, jnp.zeros((B, frames_to_add, D), dtype=x.dtype)], axis=1)

    assert out.shape == (B, L + frames_to_add, D), out.shape
    assert out.dtype == x.dtype
    assert jnp.array_equal(out, ref), "mismatch vs reference (3-D case)"

    # Also exercise the no-trailing-dims path: x of shape (B, L).
    x1 = jax.random.normal(jax.random.PRNGKey(0), (B, L), dtype=jnp.float32)
    out1 = jax.block_until_ready(prep_for_pyramid(x1, pyramid_size, layer_reduction))
    ref1 = jnp.concatenate([x1, jnp.zeros((B, frames_to_add), dtype=x1.dtype)], axis=1)
    assert jnp.array_equal(out1, ref1), "mismatch vs reference (2-D case)"

    # And a larger case that exercises multi-tile columns + the boundary tile.
    B2, L2, D2 = 2, 4000, 96
    x_big = jax.random.normal(jax.random.PRNGKey(1), (B2, L2, D2), dtype=jnp.float32)
    out_big = jax.block_until_ready(prep_for_pyramid(x_big, 3, 2))   # factor = 8
    fta2 = 8 - (L2 % 8)
    ref_big = jnp.concatenate([x_big, jnp.zeros((B2, fta2, D2), dtype=x_big.dtype)], axis=1)
    assert out_big.shape == (B2, L2 + fta2, D2)
    assert jnp.array_equal(out_big, ref_big), "mismatch vs reference (multi-tile case)"

    print("KERNEL_OK")
</pallas_src>

<mosaic_0001>
module attributes {stable_mosaic.version = 11 : i64} {
  func.func @_pad_cols_kernel(%arg0: i32, %arg1: i32, %arg2: memref<2x384xf32, #tpu.memory_space<vmem>>, %arg3: memref<2x384xf32, #tpu.memory_space<vmem>>) attributes {dimension_semantics = [#tpu.dimension_semantics<parallel>, #tpu.dimension_semantics<parallel>], iteration_bounds = array<i64: 1, 1>, scalar_prefetch = 0 : i64, scratch_operands = 0 : i64, tpu.core_type = #tpu.core_type<tc>, window_params = [{transform_indices = @transform_0, window_bounds = array<i64: 2, 384>}, {transform_indices = @transform_1, window_bounds = array<i64: 2, 384>}]} {
    %c384_i32 = arith.constant 384 : i32
    %0 = arith.muli %arg1, %c384_i32 : i32
    %c384_i32_0 = arith.constant 384 : i32
    %1 = arith.addi %0, %c384_i32_0 : i32
    %c256_i32 = arith.constant 256 : i32
    %2 = arith.cmpi sle, %1, %c256_i32 : i32
    %3 = arith.extui %2 : i1 to i32
    %c0_i32 = arith.constant 0 : i32
    %4 = arith.cmpi ne, %3, %c0_i32 : i32
    scf.if %4 {
      %c0 = arith.constant 0 : index
      %c0_7 = arith.constant 0 : index
      %14 = vector.load %arg2[%c0, %c0_7] : memref<2x384xf32, #tpu.memory_space<vmem>>, vector<2x384xf32>
      %c0_8 = arith.constant 0 : index
      %c0_9 = arith.constant 0 : index
      %15 = vector.load %arg3[%c0_8, %c0_9] : memref<2x384xf32, #tpu.memory_space<vmem>>, vector<2x384xf32>
      tpu.vector_store %arg3[%c0_8, %c0_9], %14 {strides = array<i32>} : memref<2x384xf32, #tpu.memory_space<vmem>>, vector<2x384xf32>,
    } else {
    }
    %c256_i32_1 = arith.constant 256 : i32
    %5 = arith.cmpi sge, %0, %c256_i32_1 : i32
    %6 = arith.extui %5 : i1 to i32
    %c0_i32_2 = arith.constant 0 : i32
    %7 = arith.cmpi ne, %6, %c0_i32_2 : i32
    scf.if %7 {
      %cst = arith.constant 0.000000e+00 : f32
      %14 = vector.broadcast %cst : f32 to vector<2x384xf32>
      %c0 = arith.constant 0 : index
      %c0_7 = arith.constant 0 : index
      %15 = vector.load %arg3[%c0, %c0_7] : memref<2x384xf32, #tpu.memory_space<vmem>>, vector<2x384xf32>
      tpu.vector_store %arg3[%c0, %c0_7], %14 {strides = array<i32>} : memref<2x384xf32, #tpu.memory_space<vmem>>, vector<2x384xf32>,
    } else {
    }
    %c256_i32_3 = arith.constant 256 : i32
    %8 = arith.cmpi slt, %0, %c256_i32_3 : i32
    %c384_i32_4 = arith.constant 384 : i32
    %9 = arith.addi %0, %c384_i32_4 : i32
    %c256_i32_5 = arith.constant 256 : i32
    %10 = arith.cmpi sgt, %9, %c256_i32_5 : i32
    %11 = arith.andi %8, %10 : i1
    %12 = arith.extui %11 : i1 to i32
    %c0_i32_6 = arith.constant 0 : i32
    %13 = arith.cmpi ne, %12, %c0_i32_6 : i32
    scf.if %13 {
      %14 = tpu.iota {dimensions = array<i32: 1>} : vector<2x384xi32>
      %15 = vector.broadcast %0 : i32 to vector<2x384xi32>
      %16 = arith.addi %15, %14 : vector<2x384xi32>
      %c256_i32_7 = arith.constant 256 : i32
      %17 = vector.broadcast %c256_i32_7 : i32 to vector<2x384xi32>
      %18 = arith.cmpi slt, %16, %17 : vector<2x384xi32>
      %c0 = arith.constant 0 : index
      %c0_8 = arith.constant 0 : index
      %19 = vector.load %arg2[%c0, %c0_8] : memref<2x384xf32, #tpu.memory_space<vmem>>, vector<2x384xf32>
      %cst = arith.constant 0.000000e+00 : f32
      %20 = vector.broadcast %cst : f32 to vector<2x384xf32>
      %21 = arith.select %18, %19, %20 : vector<2x384xi1>, vector<2x384xf32>
      %c0_9 = arith.constant 0 : index
      %c0_10 = arith.constant 0 : index
      %22 = vector.load %arg3[%c0_9, %c0_10] : memref<2x384xf32, #tpu.memory_space<vmem>>, vector<2x384xf32>
      tpu.vector_store %arg3[%c0_9, %c0_10], %21 {strides = array<i32>} : memref<2x384xf32, #tpu.memory_space<vmem>>, vector<2x384xf32>,
    } else {
    }
    return
  }
  func.func @transform_0(%arg0: i32, %arg1: i32) -> (i32, i32) {
    %c0_i32 = arith.constant 0 : i32
    %0 = arith.minsi %arg1, %c0_i32 : i32
    %c0_i32_0 = arith.constant 0 : i32
    return %arg0, %0 : i32, i32
  }
  func.func @transform_1(%arg0: i32, %arg1: i32) -> (i32, i32) {
    %c0_i32 = arith.constant 0 : i32
    return %arg0, %arg1 : i32, i32
  }
}

</mosaic_0001>

<bundles_post_ra>
// kernel: tpu_custom_call.1
= control target key start
LH: loop header
LB: loop body
LE: loop exit
PB: predicated region body
PF: predicated region fallthrough
CT: control target
= control target key end

     0   :  { %6 = vsyncpa [#allocation3], 0  ;;  %s180_s0 = inlined_call_operand.hbm [shape: f32[2,256], index: 0, kind: input, shape index: {}]   ;;  %s181_s1 = inlined_call_operand.hbm [shape: f32[2,384], index: 1, kind: output, shape index: {}]  }
   0x1   :  { %7 = vsyncpa [#allocation4], 0 }
   0x2   :  { %12 = vsyncadd [#allocation3], 32  ;;  %s160_s6 = smov [#allocation2]  }
   0x3   :  { %s14_s7 = sshll.u32 %s160_s6, 4  ;;  %s15_s7 = int_to_ptr.vmem [resolvable:$true] %s14_s7 }
   0x4   :  { %s124_s8 = scalar_lea.vmem %s15_s7, 64  ;;  %s128_s9 = scalar_lea.vmem %s15_s7, 96 }
   0x5   :  { %p125_p0 = scmp.ne.s32.totalorder %s15_s7, %s124_s8  ;;  %p129_p1 = scmp.lt.s32.totalorder %s15_s7, %s15_s7 }
   0x6   :  { %p130_p2 = scmp.lt.s32.totalorder %s128_s9, %s124_s8 }
   0x8   :  { %p131_p3 = por %p130_p2, %p129_p1 }
   0xa   :  { %p132_p4 = pnand %p131_p3, %p125_p0 }
   0xc   :  { %135 = shalt.err (!%p132_p4)
}
   0xd   :  { %17 = dma.hbm_to_vmem [thread:$0]  %s180_s0, 64, %s15_s7, [#allocation3]  }
   0xe   :  { %156 = dma.done.wait [#allocation3], 96  }
   0xf   :  { %157 = vsyncadd [#allocation3], 4294967200  ;;  %v82_v0 = vlaneseq  ;;  %v161_v1 = vmov 1983009808   ;;  %v162_v9 = vmov 0.0   ;;  %s163_s12 = smov [#allocation5]  }
  0x10   :  { %v80_v2 = vunpack.c.l.s4 %v161_v1  ;;  %v111_v6 = vld.sshfl [vmem:[#allocation2] sm:$0x3f pattern:$0x76325410]  ;;  %s102_s13 = sshll.u32 %s163_s12, 4  ;;  %s103_s13 = int_to_ptr.vmem [resolvable:$true] %s102_s13 }
  0x11   :  { %v83_v3 = vshrl.u32 %v82_v0, 7  ;;  %v68_v7 = vcombine.high %v111_v6, %v111_v6  ;;  %s136_s0 = scalar_lea.vmem %s103_s13, 96  ;;  %p141_p6 = scmp.lt.s32.totalorder %s103_s13, %s103_s13 }
  0x12   :  { %v81_v4 = vunpack.c.0.s8 %v80_v2  ;;  %p137_p5 = scmp.ne.s32.totalorder %s103_s13, %s136_s0  ;;  %p142_p7 = scmp.lt.s32.totalorder %s136_s0, %s136_s0 }
  0x13   :  { %v78_v8 = vcombine.low %v111_v6, %v68_v7 }
  0x14   :  { %v84_v5 = vsub.s32 %v81_v4, %v83_v3  ;;  %p143_p8 = por %p142_p7, %p141_p6 }
  0x16   :  { %v92_v10 = vrot.slane %v162_v9, %v84_v5  ;;  %v85_v11 = vrot.slane %v78_v8, %v84_v5  ;;  %p144_p9 = pnand %p143_p8, %p137_p5 }
  0x18   :  { %v93_v12 = vcombine.low %v85_v11, %v92_v10 }
  0x1a   :  { %95 = vst [vmem:[#allocation5] sm:$0x3f] %v93_v12 }
  0x1b   :  { %147 = shalt.err (!%p144_p9)
}
  0x1c   :  { %105 = dma.vmem_to_hbm [thread:$0]  %s103_s13, 96, %s181_s1, [#allocation4]  }
  0x1d   :  { %158 = dma.done.wait [#allocation4], 96  }
  0x1e   :  { %159 = vsyncadd [#allocation4], 4294967200 }
  0x1f   :  { %109 = vsyncpa [#allocation3], 1 }
  0x20   :  { %110 = vsyncpa [#allocation4], 1 }

</bundles_post_ra>
